<compile_context>
chip_gen: v6e
topology: v6e:2x2x1
jax: 0.10.0
libtpu: 0.0.40
codegen_flags: <defaults>
</compile_context>

<pallas_src>
import jax
import jax.numpy as jnp
from jax.experimental import pallas as pl
from jax.experimental.pallas import tpu as pltpu


def gcn_agg_kernel(adj_ref, h_ref, o_ref, acc_ref):
    """One (i, k) grid step of  out[i] = ReLU( sum_k  adj[i,k] @ h[k] ).

    adj_ref: [TM, TK]     bf16 tile of the pre-normalized adjacency D^-1/2 A^T D^-1/2
    h_ref:   [TK, C_pad]  bf16 tile of H = X @ W
    o_ref:   [TM, C_pad]  f32 output tile (resident across the k axis)
    acc_ref: [TM, C_pad]  f32 VMEM accumulator scratch
    """
    @pl.when(pl.program_id(1) == 0)
    def _():
        acc_ref[...] = jnp.zeros_like(acc_ref)

    acc_ref[...] += jnp.dot(adj_ref[...], h_ref[...],
                            preferred_element_type=jnp.float32)

    @pl.when(pl.program_id(1) == pl.num_programs(1) - 1)
    def _():
        o_ref[...] = jnp.maximum(acc_ref[...], 0.0).astype(o_ref.dtype)


def _round_up(x, m):
    return (x + m - 1) // m * m


def single_gcn_forward(x, edge_index, edge_weight, weight, num_nodes,
                       *, tm=256, tk=512):
    """SingleGCN forward (eval mode).  Returns [num_nodes, out_channels] f32."""
    n = int(num_nodes)
    c_out = weight.shape[1]

    # ---- wrapper-side prep (XLA): densify, normalize, project -------------
    row, col = edge_index[0], edge_index[1]
    # SparseTensor(row, col, value).t()  ->  adj_t[col, row] = value
    adj_t = jnp.zeros((n, n), jnp.float32).at[col, row].add(
        edge_weight.astype(jnp.float32))
    deg = adj_t.sum(axis=1, keepdims=True)                                # [N, 1]
    d_inv_sqrt = jnp.where(deg > 0.0,
                           jax.lax.rsqrt(jnp.maximum(deg, 1e-12)),
                           0.0)                                           # [N, 1]
    adj_norm = d_inv_sqrt * adj_t * d_inv_sqrt.reshape(1, n)  # D^-1/2 A^T D^-1/2
    h = jnp.dot(x.astype(jnp.float32), weight.astype(jnp.float32))        # [N, C_out]

    # ---- pad to lane/sublane-dense, tileable shapes ------------------------
    c_pad = _round_up(max(c_out, 128), 128)              # lane-dense output
    tm_eff = _round_up(min(tm, _round_up(n, 8)), 8)      # sublane-aligned row tile
    tk_eff = _round_up(min(tk, _round_up(n, 128)), 128)  # lane-aligned contraction tile
    n_rows = _round_up(n, tm_eff)
    n_k = _round_up(n, tk_eff)

    adj_p = jnp.zeros((n_rows, n_k), jnp.bfloat16).at[:n, :n].set(
        adj_norm.astype(jnp.bfloat16))
    h_p = jnp.zeros((n_k, c_pad), jnp.bfloat16).at[:n, :c_out].set(
        h.astype(jnp.bfloat16))

    grid = (n_rows // tm_eff, n_k // tk_eff)
    flops = 2 * n_rows * n_k * c_pad
    bytes_accessed = adj_p.size * 2 + h_p.size * 2 + n_rows * c_pad * 4

    out_p = pl.pallas_call(
        gcn_agg_kernel,
        out_shape=jax.ShapeDtypeStruct((n_rows, c_pad), jnp.float32),
        grid=grid,
        in_specs=[
            pl.BlockSpec((tm_eff, tk_eff), lambda i, k: (i, k)),   # adj tile
            pl.BlockSpec((tk_eff, c_pad), lambda i, k: (k, 0)),    # H tile
        ],
        out_specs=pl.BlockSpec((tm_eff, c_pad), lambda i, k: (i, 0)),
        scratch_shapes=[pltpu.VMEM((tm_eff, c_pad), jnp.float32)],
        compiler_params=pltpu.CompilerParams(
            dimension_semantics=("parallel", "arbitrary"),
            vmem_limit_bytes=64 * 1024 * 1024),
        cost_estimate=pl.CostEstimate(
            flops=flops, transcendentals=0, bytes_accessed=bytes_accessed),
    )(adj_p, h_p)

    return out_p[:n, :c_out]


if __name__ == "__main__":
    # Small, module-consistent shapes.
    size_u, size_v = 8, 8
    num_nodes = size_u + size_v          # 16
    in_channels, out_channels = 32, 32
    num_edges = 48

    key = jax.random.PRNGKey(0)
    k_x, k_src, k_dst, k_w, k_weight = jax.random.split(key, 5)

    # Node features [N, C_in]
    x = jax.random.normal(k_x, (num_nodes, in_channels), dtype=jnp.float32)

    # edge_index [2, E], edge_weight [E] (positive weights)
    src = jax.random.randint(k_src, (num_edges,), 0, num_nodes, dtype=jnp.int32)
    dst = jax.random.randint(k_dst, (num_edges,), 0, num_nodes, dtype=jnp.int32)
    edge_index = jnp.stack([src, dst], axis=0)
    edge_weight = jax.random.uniform(k_w, (num_edges,), dtype=jnp.float32,
                                     minval=0.1, maxval=1.0)

    # Deterministic GCNConv weight (glorot-style), bias=False.
    limit = (6.0 / (in_channels + out_channels)) ** 0.5
    gcn_weight = jax.random.uniform(k_weight, (in_channels, out_channels),
                                    dtype=jnp.float32, minval=-limit, maxval=limit)

    out = single_gcn_forward(x, edge_index, edge_weight, gcn_weight, num_nodes)
    out = jax.block_until_ready(out)

    # Pure-JAX reference with the same bf16 adjacency / H rounding (f32 accum).
    adj_t_ref = jnp.zeros((num_nodes, num_nodes), jnp.float32).at[
        edge_index[1], edge_index[0]].add(edge_weight)
    deg = adj_t_ref.sum(axis=1, keepdims=True)
    d = jnp.where(deg > 0, 1.0 / jnp.sqrt(deg), 0.0)
    adj_norm_ref = (d * adj_t_ref * d.reshape(1, num_nodes))
    h_ref = x @ gcn_weight
    ref = jnp.maximum(
        jnp.dot(adj_norm_ref.astype(jnp.bfloat16).astype(jnp.float32),
                h_ref.astype(jnp.bfloat16).astype(jnp.float32)),
        0.0)
    assert out.shape == (num_nodes, out_channels)
    assert jnp.allclose(out, ref, atol=1e-2, rtol=1e-2), "mismatch vs JAX reference"

    print("KERNEL_OK")
</pallas_src>

<mosaic_0001>
module attributes {stable_mosaic.version = 11 : i64} {
  func.func @gcn_agg_kernel(%arg0: i32, %arg1: i32, %arg2: memref<16x128xbf16, #tpu.memory_space<vmem>>, %arg3: memref<128x128xbf16, #tpu.memory_space<vmem>>, %arg4: memref<16x128xf32, #tpu.memory_space<vmem>>, %arg5: memref<16x128xf32, #tpu.memory_space<vmem>>) attributes {dimension_semantics = [#tpu.dimension_semantics<parallel>, #tpu.dimension_semantics<arbitrary>], iteration_bounds = array<i64: 1, 1>, scalar_prefetch = 0 : i64, scratch_operands = 1 : i64, tpu.core_type = #tpu.core_type<tc>, window_params = [{transform_indices = @transform_0, window_bounds = array<i64: 16, 128>}, {transform_indices = @transform_1, window_bounds = array<i64: 128, 128>}, {transform_indices = @transform_2, window_bounds = array<i64: 16, 128>}]} {
    %c0_i32 = arith.constant 0 : i32
    %0 = arith.cmpi eq, %arg1, %c0_i32 : i32
    %1 = arith.extui %0 : i1 to i32
    %c0_i32_0 = arith.constant 0 : i32
    %2 = arith.cmpi ne, %1, %c0_i32_0 : i32
    scf.if %2 {
      %cst_10 = arith.constant 0.000000e+00 : f32
      %12 = vector.broadcast %cst_10 : f32 to vector<16x128xf32>
      %c0_11 = arith.constant 0 : index
      %c0_12 = arith.constant 0 : index
      %13 = vector.load %arg5[%c0_11, %c0_12] : memref<16x128xf32, #tpu.memory_space<vmem>>, vector<16x128xf32>
      tpu.vector_store %arg5[%c0_11, %c0_12], %12 {strides = array<i32>} : memref<16x128xf32, #tpu.memory_space<vmem>>, vector<16x128xf32>,
    } else {
    }
    %c0 = arith.constant 0 : index
    %c0_1 = arith.constant 0 : index
    %3 = vector.load %arg5[%c0, %c0_1] : memref<16x128xf32, #tpu.memory_space<vmem>>, vector<16x128xf32>
    %c0_2 = arith.constant 0 : index
    %c0_3 = arith.constant 0 : index
    %4 = vector.load %arg2[%c0_2, %c0_3] : memref<16x128xbf16, #tpu.memory_space<vmem>>, vector<16x128xbf16>
    %c0_4 = arith.constant 0 : index
    %c0_5 = arith.constant 0 : index
    %5 = vector.load %arg3[%c0_4, %c0_5] : memref<128x128xbf16, #tpu.memory_space<vmem>>, vector<128x128xbf16>
    %cst = arith.constant dense<0.000000e+00> : vector<16x128xf32>
    %6 = tpu.matmul %4, %5, %cst {dimension_numbers = #tpu.dot_dimension_numbers<[1], [0], [0], [1], [0, 0, 1, 1], [], []>} : vector<16x128xbf16>, vector<128x128xbf16>, vector<16x128xf32> -> vector<16x128xf32>
    %7 = arith.addf %3, %6 : vector<16x128xf32>
    %c0_6 = arith.constant 0 : index
    %c0_7 = arith.constant 0 : index
    %8 = vector.load %arg5[%c0_6, %c0_7] : memref<16x128xf32, #tpu.memory_space<vmem>>, vector<16x128xf32>
    tpu.vector_store %arg5[%c0_6, %c0_7], %7 {strides = array<i32>} : memref<16x128xf32, #tpu.memory_space<vmem>>, vector<16x128xf32>,
    %c0_i32_8 = arith.constant 0 : i32
    %9 = arith.cmpi eq, %arg1, %c0_i32_8 : i32
    %10 = arith.extui %9 : i1 to i32
    %c0_i32_9 = arith.constant 0 : i32
    %11 = arith.cmpi ne, %10, %c0_i32_9 : i32
    scf.if %11 {
      %c0_10 = arith.constant 0 : index
      %c0_11 = arith.constant 0 : index
      %12 = vector.load %arg5[%c0_10, %c0_11] : memref<16x128xf32, #tpu.memory_space<vmem>>, vector<16x128xf32>
      %cst_12 = arith.constant 0.000000e+00 : f32
      %13 = vector.broadcast %cst_12 : f32 to vector<16x128xf32>
      %14 = arith.maximumf %12, %13 : vector<16x128xf32>
      %c0_13 = arith.constant 0 : index
      %c0_14 = arith.constant 0 : index
      %15 = vector.load %arg4[%c0_13, %c0_14] : memref<16x128xf32, #tpu.memory_space<vmem>>, vector<16x128xf32>
      tpu.vector_store %arg4[%c0_13, %c0_14], %14 {strides = array<i32>} : memref<16x128xf32, #tpu.memory_space<vmem>>, vector<16x128xf32>,
    } else {
    }
    return
  }
  func.func @transform_0(%arg0: i32, %arg1: i32) -> (i32, i32) {
    %c0_i32 = arith.constant 0 : i32
    return %arg0, %arg1 : i32, i32
  }
  func.func @transform_1(%arg0: i32, %arg1: i32) -> (i32, i32) {
    %c0_i32 = arith.constant 0 : i32
    %c0_i32_0 = arith.constant 0 : i32
    return %arg1, %c0_i32 : i32, i32
  }
  func.func @transform_2(%arg0: i32, %arg1: i32) -> (i32, i32) {
    %c0_i32 = arith.constant 0 : i32
    %c0_i32_0 = arith.constant 0 : i32
    return %arg0, %c0_i32 : i32, i32
  }
}

</mosaic_0001>

<bundles_post_ra>
// kernel: tpu_custom_call.1
= control target key start
LH: loop header
LB: loop body
LE: loop exit
PB: predicated region body
PF: predicated region fallthrough
CT: control target
= control target key end

     0   :  { %7 = vsyncpa [#allocation4], 0  ;;  %s348_s0 = inlined_call_operand.hbm [shape: bf16[16,128], index: 0, kind: input, shape index: {}]   ;;  %s349_s1 = inlined_call_operand.hbm [shape: bf16[128,128], index: 1, kind: input, shape index: {}]   ;;  %s350_s2 = inlined_call_operand.hbm [shape: f32[16,128], index: 2, kind: output, shape index: {}]  }
   0x1   :  { %8 = vsyncpa [#allocation7], 0 }
   0x2   :  { %9 = vsyncpa [#allocation5], 0  ;;  %s315_s9 = smov [#allocation3]  }
   0x3   :  { %s15_s10 = sshll.u32 %s315_s9, 4  ;;  %s16_s10 = int_to_ptr.vmem [resolvable:$true] %s15_s10 }
   0x4   :  { %s257_s11 = scalar_lea.vmem %s16_s10, 128  ;;  %p262_p1 = scmp.lt.s32.totalorder %s16_s10, %s16_s10 }
   0x5   :  { %p258_p0 = scmp.ne.s32.totalorder %s16_s10, %s257_s11  ;;  %p263_p2 = scmp.lt.s32.totalorder %s257_s11, %s257_s11 }
   0x7   :  { %p264_p3 = por %p263_p2, %p262_p1 }
   0x9   :  { %p265_p4 = pnand %p264_p3, %p258_p0 }
   0xb   :  { %268 = shalt.err (!%p265_p4)
}
   0xc   :  { %s316_s12 = smov 64   ;;  %s317_s13 = smov 4  }
   0xd   :  { %21 = dma.hbm_to_vmem [thread:$0]  %s348_s0, 128, %s16_s10, [#allocation4], %s316_s12, %s316_s12, %s317_s13  }
   0xe   :  { %s318_s16 = smov [#allocation6]  }
   0xf   :  { %s27_s17 = sshll.u32 %s318_s16, 4  ;;  %s28_s17 = int_to_ptr.vmem [resolvable:$true] %s27_s17 }
  0x10   :  { %s277_s18 = scalar_lea.vmem %s28_s17, 1024  ;;  %p282_p6 = scmp.lt.s32.totalorder %s28_s17, %s28_s17 }
  0x11   :  { %p278_p5 = scmp.ne.s32.totalorder %s28_s17, %s277_s18  ;;  %p283_p7 = scmp.lt.s32.totalorder %s277_s18, %s277_s18 }
  0x13   :  { %p284_p8 = por %p283_p7, %p282_p6 }
  0x15   :  { %p285_p9 = pnand %p284_p8, %p278_p5 }
  0x17   :  { %288 = shalt.err (!%p285_p9)
}
  0x18   :  { %33 = dma.hbm_to_vmem [thread:$0]  %s349_s1, 1024, %s28_s17, [#allocation7], %s316_s12, %s316_s12, %s317_s13  }
  0x19   :  { %309 = dma.done.wait [#allocation4], 128  }
  0x1a   :  { %310 = vsyncadd [#allocation4], 4294967168 }
  0x1b   :  { %311 = dma.done.wait [#allocation7], 1024  }
  0x1c   :  { %312 = vsyncadd [#allocation7], 4294966272  ;;  %v319_v0 = vmov 0.0   ;;  %vm320_vm0 = vmmov 0   ;;  %v240_v1 = vld [vmem:[#allocation6 + $0x38] sm:$0xff]   ;;  %v241_v2 = vld [vmem:[#allocation6 + $0x30] sm:$0xff]  }
  0x1d   :  { %211 = vmatprep.subr.bf16.mxu0 %v319_v0  ;;  %227 = vmatprep.mubr.msk.bf16.mxu0 %vm320_vm0, %v319_v0  ;;  %v242_v3 = vld [vmem:[#allocation6 + $0x28] sm:$0xff]   ;;  %v243_v4 = vld [vmem:[#allocation6 + $0x20] sm:$0xff]   ;;  %v244_v5 = vld [vmem:[#allocation6 + $0x18] sm:$0xff]   ;;  %s321_s0 = smov [#allocation8]  }
  0x1e   :  { %212 = vmatpush3.bf16.msra.mxu0 %v240_v1  ;;  %v245_v6 = vld [vmem:[#allocation6 + $0x10] sm:$0xff]   ;;  %v246_v7 = vld [vmem:[#allocation6 + $0x8] sm:$0xff]   ;;  %v247_v8 = vld [vmem:[#allocation6] sm:$0xff]   ;;  %s180_s1 = sshll.u32 %s321_s0, 4  ;;  %s181_s1 = int_to_ptr.vmem [resolvable:$true] %s180_s1 }
  0x1f   :  { %213 = vmatprep.subr.bf16.mxu0 %v319_v0  ;;  %v248_v9 = vld [vmem:[#allocation3] sm:$0xff]   ;;  %s289_s21 = scalar_lea.vmem %s181_s1, 256  ;;  %p294_p11 = scmp.lt.s32.totalorder %s181_s1, %s181_s1 }
  0x20   :  { %p290_p10 = scmp.ne.s32.totalorder %s181_s1, %s289_s21  ;;  %p295_p12 = scmp.lt.s32.totalorder %s289_s21, %s289_s21 }
  0x22   :  { %214 = vmatpush3.bf16.msra.mxu0 %v241_v2  ;;  %p296_p13 = por %p295_p12, %p294_p11 }
  0x23   :  { %215 = vmatprep.subr.bf16.mxu0 %v319_v0 }
  0x24   :  { %p297_p0 = pnand %p296_p13, %p290_p10 }
  0x26   :  { %216 = vmatpush3.bf16.msra.mxu0 %v242_v3 }
  0x27   :  { %217 = vmatprep.subr.bf16.mxu0 %v319_v0 }
  0x2a   :  { %218 = vmatpush3.bf16.msra.mxu0 %v243_v4 }
  0x2b   :  { %219 = vmatprep.subr.bf16.mxu0 %v319_v0 }
  0x2e   :  { %220 = vmatpush3.bf16.msra.mxu0 %v244_v5 }
  0x2f   :  { %221 = vmatprep.subr.bf16.mxu0 %v319_v0 }
  0x32   :  { %222 = vmatpush3.bf16.msra.mxu0 %v245_v6 }
  0x33   :  { %223 = vmatprep.subr.bf16.mxu0 %v319_v0 }
  0x36   :  { %224 = vmatpush3.bf16.msra.mxu0 %v246_v7 }
  0x37   :  { %225 = vmatprep.subr.bf16.mxu0 %v319_v0 }
  0x3a   :  { %226 = vmatpush3.bf16.msra.mxu0 %v247_v8 }
  0x3d   :  { %228 = vmatmul.mubr.bf16.vlgmr.msra.gmra.mxu0 %v248_v9 }
  0xfd   :  { %v155_v10 = vpop.f32.mrf.mxu0 }
  0xfe   :  { %v171_v11 = vmax.f32 %v155_v10, 0.0 }
  0xff   :  { %v229_v12 = vpop.f32.mrf.mxu0 }
 0x100   :  { %173 = vst [vmem:[#allocation8] sm:$0xff] %v171_v11 }
 0x101   :  { %v158_v13 = vpop.f32.mrf.mxu0 }
 0x102   :  { %v172_v14 = vmax.f32 %v158_v13, 0.0 }
 0x103   :  { %v230_v15 = vpop.f32.mrf.mxu0 }
 0x104   :  { %174 = vst [vmem:[#allocation8 + $0x8] sm:$0xff] %v172_v14 }
 0x105   :  { %300 = shalt.err (!%p297_p0)
}
 0x106   :  { %s322_s22 = smov 128   ;;  %s323_s23 = smov 8  }
 0x107   :  { %186 = dma.vmem_to_hbm [thread:$0]  %s181_s1, 256, %s350_s2, [#allocation5], %s322_s22, %s322_s22, %s323_s23  }
 0x108   :  { %313 = dma.done.wait [#allocation5], 256  }
 0x109   :  { %314 = vsyncadd [#allocation5], 4294967040 }
 0x10a   :  { %190 = vsyncpa [#allocation4], 1 }
 0x10b   :  { %191 = vsyncpa [#allocation7], 1 }
 0x10c   :  { %192 = vsyncpa [#allocation5], 1 }

</bundles_post_ra>
